<compile_context>
chip_gen: v5e
topology: v5e:2x2
jax: 0.10.0
libtpu: 0.0.40
codegen_flags: <defaults>
</compile_context>

<pallas_src>
import functools

import jax
import jax.numpy as jnp
from jax.experimental import pallas as pl
from jax.experimental.pallas import tpu as pltpu

_LANE = 128


def _round_up(n, m):
    return ((n + m - 1) // m) * m


def _cdiv(a, b):
    return -(-a // b)


def _pad2(a, rows, cols):
    return jnp.pad(a, ((0, rows - a.shape[0]), (0, cols - a.shape[1])))


def _device_settings():
    """Per-generation (max batch tile, scoped VMEM request, core split)."""
    max_tile, vmem, split = 512, 32 * 1024 * 1024, 1   # safe everywhere incl. v7x
    try:
        kind = jax.devices()[0].device_kind.lower()
        if "v7" in kind:
            split = 2                                   # 2 TensorCores per chip
        elif ("v5" in kind) or ("v6" in kind):
            max_tile, vmem = 1024, 64 * 1024 * 1024     # 128 MiB physical VMEM
    except Exception:
        pass
    return max_tile, vmem, split


def _pick_tile(batch, numm_p, sze_p, cls_p, max_tile, vmem_limit):
    """Largest multiple-of-16 batch tile whose rough footprint fits VMEM."""
    tile = min(max_tile, _round_up(batch, 16))
    tile = max(16, (tile // 16) * 16)

    def footprint(t):
        streams = t * (numm_p * 2 + sze_p * 2 + cls_p * 4) * 2   # dbl-buffered x/h2/out
        temps = t * sze_p * 4 * 3                                # f32 h1/h2/masked
        weights = (numm_p * sze_p + sze_p * sze_p + sze_p * cls_p) * 2 * 2
        return streams + temps + weights

    while tile > 16 and footprint(tile) > 0.6 * vmem_limit:
        tile = max(16, (tile // 2 // 16) * 16)
    return tile


# ---------------------------------------------------------------------------
# Fused small-batch path: whole network + exact two-pass BatchNorm in one call.
# ---------------------------------------------------------------------------
def _fused_kernel(x_ref, w1_ref, b1_ref, w2_ref, b2_ref, g_ref, be_ref,
                  w3_ref, b3_ref, o_ref, *, inv_n):
    h1 = jnp.dot(x_ref[...], w1_ref[...],
                 preferred_element_type=jnp.float32) + b1_ref[...]
    h1 = jnp.maximum(h1, 0.0)
    h2 = jnp.dot(h1.astype(jnp.bfloat16), w2_ref[...],
                 preferred_element_type=jnp.float32) + b2_ref[...]
    mean = jnp.sum(h2, axis=0, keepdims=True) * inv_n
    d = h2 - mean
    var = jnp.sum(d * d, axis=0, keepdims=True) * inv_n      # two-pass: no cancellation
    inv_std = jax.lax.rsqrt(var + 1e-5)                      # EUP slot, ~free
    scale = inv_std * g_ref[...]
    shift = be_ref[...] - mean * scale
    h3 = jnp.maximum(h2 * scale + shift, 0.0)
    o_ref[...] = jnp.dot(h3.astype(jnp.bfloat16), w3_ref[...],
                         preferred_element_type=jnp.float32) + b3_ref[...]


# ---------------------------------------------------------------------------
# Pass 1: h2 = ReLU(x @ W1 + b1) @ W2 + b2 ; per-core masked (sum, sumsq) of h2.
# ---------------------------------------------------------------------------
def _h2_stats_kernel(x_ref, w1_ref, b1_ref, w2_ref, b2_ref,
                     h2_ref, sum_ref, ssq_ref, *, tile, n_steps, batch):
    c = pl.program_id(0)
    i = pl.program_id(1)

    h1 = jnp.dot(x_ref[...], w1_ref[...],
                 preferred_element_type=jnp.float32) + b1_ref[...]
    h1 = jnp.maximum(h1, 0.0)
    h2 = jnp.dot(h1.astype(jnp.bfloat16), w2_ref[...],
                 preferred_element_type=jnp.float32) + b2_ref[...]
    h2_ref[...] = h2.astype(h2_ref.dtype)                    # bf16 stream to HBM

    @pl.when(i == 0)
    def _():
        sum_ref[...] = jnp.zeros_like(sum_ref)
        ssq_ref[...] = jnp.zeros_like(ssq_ref)

    # Mask padded batch rows out of the global statistics.
    start = (c * n_steps + i) * tile
    rows = jax.lax.broadcasted_iota(jnp.int32, (tile, 1), 0) + start
    h2m = jnp.where(rows < batch, h2, 0.0)
    sum_ref[...] += jnp.sum(h2m, axis=0, keepdims=True)[None]
    ssq_ref[...] += jnp.sum(h2m * h2m, axis=0, keepdims=True)[None]


# ---------------------------------------------------------------------------
# Pass 2: out = ReLU(h2 * scale + shift) @ W3 + b3   (fused BN affine).
# ---------------------------------------------------------------------------
def _bn_relu_out_kernel(h2_ref, scale_ref, shift_ref, w3_ref, b3_ref, o_ref):
    h2 = h2_ref[...].astype(jnp.float32)
    h3 = jnp.maximum(h2 * scale_ref[...] + shift_ref[...], 0.0)
    o_ref[...] = jnp.dot(h3.astype(jnp.bfloat16), w3_ref[...],
                         preferred_element_type=jnp.float32) + b3_ref[...]


@functools.partial(jax.jit, static_argnames=("force_tile",))
def mlp_bn_forward(x, w1, b1, w2, b2, gamma, beta, w3, b3, force_tile=None):
    batch, numm = x.shape
    sze = w1.shape[1]
    classes = w3.shape[1]

    numm_p = _round_up(numm, _LANE)
    sze_p = _round_up(sze, _LANE)
    cls_p = _round_up(classes, _LANE)

    max_tile, vmem_limit, split = _device_settings()
    if force_tile is not None:
        max_tile = int(force_tile)
    tile = _pick_tile(batch, numm_p, sze_p, cls_p, max_tile, vmem_limit)

    # Lane-pad everything; MXU operands in bf16, biases / BN params stay f32.
    w1p = _pad2(w1, numm_p, sze_p).astype(jnp.bfloat16)
    b1p = _pad2(b1, 1, sze_p)
    w2p = _pad2(w2, sze_p, sze_p).astype(jnp.bfloat16)
    b2p = _pad2(b2, 1, sze_p)
    gp = _pad2(gamma, 1, sze_p)
    bp = _pad2(beta, 1, sze_p)
    w3p = _pad2(w3, sze_p, cls_p).astype(jnp.bfloat16)
    b3p = _pad2(b3, 1, cls_p)

    # ---- fused path: whole batch fits one tile -> single kernel -----------
    if batch <= tile:
        xp = _pad2(x, batch, numm_p).astype(jnp.bfloat16)
        full = lambda i: (0, 0)
        out_p = pl.pallas_call(
            functools.partial(_fused_kernel, inv_n=1.0 / batch),
            out_shape=jax.ShapeDtypeStruct((batch, cls_p), jnp.float32),
            grid=(1,),
            in_specs=[pl.BlockSpec((batch, numm_p), full),
                      pl.BlockSpec((numm_p, sze_p), full),
                      pl.BlockSpec((1, sze_p), full),
                      pl.BlockSpec((sze_p, sze_p), full),
                      pl.BlockSpec((1, sze_p), full),
                      pl.BlockSpec((1, sze_p), full),
                      pl.BlockSpec((1, sze_p), full),
                      pl.BlockSpec((sze_p, cls_p), full),
                      pl.BlockSpec((1, cls_p), full)],
            out_specs=pl.BlockSpec((batch, cls_p), full),
            compiler_params=pltpu.CompilerParams(vmem_limit_bytes=vmem_limit),
        )(xp, w1p, b1p, w2p, b2p, gp, bp, w3p, b3p)
        return out_p[:, :classes]

    # ---- two-pass tiled path ----------------------------------------------
    n_tiles = _cdiv(batch, tile)
    if n_tiles < split:
        split = 1
    n_steps = _cdiv(n_tiles, split)
    rows_p = split * n_steps * tile                   # padded rows (masked in stats)

    xp = _pad2(x, rows_p, numm_p).astype(jnp.bfloat16)

    full2 = lambda c, i: (0, 0)
    row2 = lambda c, i: (c * n_steps + i, 0)
    stats = lambda c, i: (c, 0, 0)

    h2, psum, pssq = pl.pallas_call(
        functools.partial(_h2_stats_kernel, tile=tile, n_steps=n_steps, batch=batch),
        out_shape=(jax.ShapeDtypeStruct((rows_p, sze_p), jnp.bfloat16),
                   jax.ShapeDtypeStruct((split, 1, sze_p), jnp.float32),
                   jax.ShapeDtypeStruct((split, 1, sze_p), jnp.float32)),
        grid=(split, n_steps),
        in_specs=[pl.BlockSpec((tile, numm_p), row2),
                  pl.BlockSpec((numm_p, sze_p), full2),
                  pl.BlockSpec((1, sze_p), full2),
                  pl.BlockSpec((sze_p, sze_p), full2),
                  pl.BlockSpec((1, sze_p), full2)],
        out_specs=[pl.BlockSpec((tile, sze_p), row2),
                   pl.BlockSpec((1, 1, sze_p), stats),
                   pl.BlockSpec((1, 1, sze_p), stats)],
        compiler_params=pltpu.CompilerParams(
            dimension_semantics=("parallel", "arbitrary"),   # v7x: split cores, exact stats
            vmem_limit_bytes=vmem_limit),
    )(xp, w1p, b1p, w2p, b2p)

    # Tiny (1, sze_p) vectors: fold BN into scale/shift in plain JAX.
    sums = jnp.sum(psum, axis=0)
    ssq = jnp.sum(pssq, axis=0)
    inv_n = 1.0 / float(batch)
    mean = sums * inv_n
    var = jnp.maximum(ssq * inv_n - mean * mean, 0.0)
    inv_std = jax.lax.rsqrt(var + 1e-5)
    scale = inv_std * gp
    shift = bp - mean * scale

    row1 = lambda i: (i, 0)
    full1 = lambda i: (0, 0)
    out_p = pl.pallas_call(
        _bn_relu_out_kernel,
        out_shape=jax.ShapeDtypeStruct((rows_p, cls_p), jnp.float32),
        grid=(rows_p // tile,),
        in_specs=[pl.BlockSpec((tile, sze_p), row1),
                  pl.BlockSpec((1, sze_p), full1),
                  pl.BlockSpec((1, sze_p), full1),
                  pl.BlockSpec((sze_p, cls_p), full1),
                  pl.BlockSpec((1, cls_p), full1)],
        out_specs=pl.BlockSpec((tile, cls_p), row1),
        compiler_params=pltpu.CompilerParams(
            dimension_semantics=("parallel",),
            vmem_limit_bytes=vmem_limit),
    )(h2, scale, shift, w3p, b3p)

    return out_p[:batch, :classes]


def init_params(key, numm, sze, classes):
    # PyTorch-style uniform(-1/sqrt(fan_in), 1/sqrt(fan_in)) init.
    ks = jax.random.split(key, 6)

    def lin(kw, kb, fan_in, fan_out):
        bound = 1.0 / jnp.sqrt(fan_in)
        w = jax.random.uniform(kw, (fan_in, fan_out), jnp.float32, -bound, bound)
        b = jax.random.uniform(kb, (1, fan_out), jnp.float32, -bound, bound)
        return w, b

    w1, b1 = lin(ks[0], ks[1], numm, sze)
    w2, b2 = lin(ks[2], ks[3], sze, sze)
    w3, b3 = lin(ks[4], ks[5], sze, classes)
    gamma = jnp.ones((1, sze), jnp.float32)   # BatchNorm1d default weight
    beta = jnp.zeros((1, sze), jnp.float32)   # BatchNorm1d default bias
    return w1, b1, w2, b2, gamma, beta, w3, b3


def _reference(x, w1, b1, w2, b2, gamma, beta, w3, b3):
    h1 = jnp.maximum(x @ w1 + b1, 0.0)
    h2 = h1 @ w2 + b2
    mean = jnp.mean(h2, axis=0, keepdims=True)
    var = jnp.mean((h2 - mean) ** 2, axis=0, keepdims=True)
    h3 = jnp.maximum((h2 - mean) * jax.lax.rsqrt(var + 1e-5) * gamma + beta, 0.0)
    return h3 @ w3 + b3


if __name__ == "__main__":
    numm, sze, classes = 32, 64, 16
    key = jax.random.PRNGKey(0)
    kx1, kx2, kp = jax.random.split(key, 3)
    params = init_params(kp, numm, sze, classes)

    # Config A: small batch -> fused single-kernel path.
    batch_a = 8
    xa = jax.random.normal(kx1, (batch_a, numm), jnp.float32)
    out_a = jax.block_until_ready(mlp_bn_forward(xa, *params))
    assert out_a.shape == (batch_a, classes)
    assert out_a.dtype == jnp.float32
    ref_a = _reference(xa, *params)
    err_a = float(jnp.max(jnp.abs(out_a - ref_a)))
    assert err_a < 0.1, f"fused path max abs error too large: {err_a}"

    # Config B: force the tiled two-pass path (masked stats, cdiv grid).
    batch_b = 50
    xb = jax.random.normal(kx2, (batch_b, numm), jnp.float32)
    out_b = jax.block_until_ready(mlp_bn_forward(xb, *params, force_tile=16))
    assert out_b.shape == (batch_b, classes)
    ref_b = _reference(xb, *params)
    err_b = float(jnp.max(jnp.abs(out_b - ref_b)))
    assert err_b < 0.1, f"two-pass path max abs error too large: {err_b}"

    print("KERNEL_OK")
</pallas_src>

<mosaic_0001>
module attributes {stable_mosaic.version = 11 : i64} {
  func.func @_fused_kernel(%arg0: i32, %arg1: memref<8x128xbf16, #tpu.memory_space<vmem>>, %arg2: memref<128x128xbf16, #tpu.memory_space<vmem>>, %arg3: memref<1x128xf32, #tpu.memory_space<vmem>>, %arg4: memref<128x128xbf16, #tpu.memory_space<vmem>>, %arg5: memref<1x128xf32, #tpu.memory_space<vmem>>, %arg6: memref<1x128xf32, #tpu.memory_space<vmem>>, %arg7: memref<1x128xf32, #tpu.memory_space<vmem>>, %arg8: memref<128x128xbf16, #tpu.memory_space<vmem>>, %arg9: memref<1x128xf32, #tpu.memory_space<vmem>>, %arg10: memref<8x128xf32, #tpu.memory_space<vmem>>) attributes {dimension_semantics = [#tpu.dimension_semantics<arbitrary>], iteration_bounds = array<i64: 1>, scalar_prefetch = 0 : i64, scratch_operands = 0 : i64, tpu.core_type = #tpu.core_type<tc>, window_params = [{pipeline_mode = #tpu.pipeline_mode<synchronous>, transform_indices = @transform_0, window_bounds = array<i64: 8, 128>}, {pipeline_mode = #tpu.pipeline_mode<synchronous>, transform_indices = @transform_1, window_bounds = array<i64: 128, 128>}, {pipeline_mode = #tpu.pipeline_mode<synchronous>, transform_indices = @transform_2, window_bounds = array<i64: 1, 128>}, {pipeline_mode = #tpu.pipeline_mode<synchronous>, transform_indices = @transform_3, window_bounds = array<i64: 128, 128>}, {pipeline_mode = #tpu.pipeline_mode<synchronous>, transform_indices = @transform_4, window_bounds = array<i64: 1, 128>}, {pipeline_mode = #tpu.pipeline_mode<synchronous>, transform_indices = @transform_5, window_bounds = array<i64: 1, 128>}, {pipeline_mode = #tpu.pipeline_mode<synchronous>, transform_indices = @transform_6, window_bounds = array<i64: 1, 128>}, {pipeline_mode = #tpu.pipeline_mode<synchronous>, transform_indices = @transform_7, window_bounds = array<i64: 128, 128>}, {pipeline_mode = #tpu.pipeline_mode<synchronous>, transform_indices = @transform_8, window_bounds = array<i64: 1, 128>}, {pipeline_mode = #tpu.pipeline_mode<synchronous>, transform_indices = @transform_9, window_bounds = array<i64: 8, 128>}]} {
    %c0 = arith.constant 0 : index
    %c0_0 = arith.constant 0 : index
    %0 = vector.load %arg1[%c0, %c0_0] : memref<8x128xbf16, #tpu.memory_space<vmem>>, vector<8x128xbf16>
    %c0_1 = arith.constant 0 : index
    %c0_2 = arith.constant 0 : index
    %1 = vector.load %arg2[%c0_1, %c0_2] : memref<128x128xbf16, #tpu.memory_space<vmem>>, vector<128x128xbf16>
    %cst = arith.constant dense<0.000000e+00> : vector<8x128xf32>
    %2 = tpu.matmul %0, %1, %cst {dimension_numbers = #tpu.dot_dimension_numbers<[1], [0], [0], [1], [0, 0, 1, 1], [], []>} : vector<8x128xbf16>, vector<128x128xbf16>, vector<8x128xf32> -> vector<8x128xf32>
    %c0_3 = arith.constant 0 : index
    %c0_4 = arith.constant 0 : index
    %3 = vector.load %arg3[%c0_3, %c0_4] : memref<1x128xf32, #tpu.memory_space<vmem>>, vector<1x128xf32>
    %4 = vector.broadcast %3 : vector<1x128xf32> to vector<8x128xf32>
    %5 = arith.addf %2, %4 : vector<8x128xf32>
    %cst_5 = arith.constant 0.000000e+00 : f32
    %6 = vector.broadcast %cst_5 : f32 to vector<8x128xf32>
    %7 = arith.maximumf %5, %6 : vector<8x128xf32>
    %8 = arith.truncf %7 : vector<8x128xf32> to vector<8x128xbf16>
    %c0_6 = arith.constant 0 : index
    %c0_7 = arith.constant 0 : index
    %9 = vector.load %arg4[%c0_6, %c0_7] : memref<128x128xbf16, #tpu.memory_space<vmem>>, vector<128x128xbf16>
    %cst_8 = arith.constant dense<0.000000e+00> : vector<8x128xf32>
    %10 = tpu.matmul %8, %9, %cst_8 {dimension_numbers = #tpu.dot_dimension_numbers<[1], [0], [0], [1], [0, 0, 1, 1], [], []>} : vector<8x128xbf16>, vector<128x128xbf16>, vector<8x128xf32> -> vector<8x128xf32>
    %c0_9 = arith.constant 0 : index
    %c0_10 = arith.constant 0 : index
    %11 = vector.load %arg5[%c0_9, %c0_10] : memref<1x128xf32, #tpu.memory_space<vmem>>, vector<1x128xf32>
    %12 = vector.broadcast %11 : vector<1x128xf32> to vector<8x128xf32>
    %13 = arith.addf %10, %12 : vector<8x128xf32>
    %cst_11 = arith.constant dense<0.000000e+00> : vector<128xf32>
    %14 = vector.multi_reduction <add>, %13, %cst_11 [0] : vector<8x128xf32> to vector<128xf32>
    %15 = vector.shape_cast %14 : vector<128xf32> to vector<1x128xf32>
    %cst_12 = arith.constant 1.250000e-01 : f32
    %16 = vector.broadcast %cst_12 : f32 to vector<1x128xf32>
    %17 = arith.mulf %15, %16 : vector<1x128xf32>
    %18 = vector.broadcast %17 : vector<1x128xf32> to vector<8x128xf32>
    %19 = arith.subf %13, %18 : vector<8x128xf32>
    %20 = arith.mulf %19, %19 : vector<8x128xf32>
    %cst_13 = arith.constant dense<0.000000e+00> : vector<128xf32>
    %21 = vector.multi_reduction <add>, %20, %cst_13 [0] : vector<8x128xf32> to vector<128xf32>
    %22 = vector.shape_cast %21 : vector<128xf32> to vector<1x128xf32>
    %cst_14 = arith.constant 1.250000e-01 : f32
    %23 = vector.broadcast %cst_14 : f32 to vector<1x128xf32>
    %24 = arith.mulf %22, %23 : vector<1x128xf32>
    %cst_15 = arith.constant 9.99999974E-6 : f32
    %25 = vector.broadcast %cst_15 : f32 to vector<1x128xf32>
    %26 = arith.addf %24, %25 : vector<1x128xf32>
    %27 = math.rsqrt %26 : vector<1x128xf32>
    %c0_16 = arith.constant 0 : index
    %c0_17 = arith.constant 0 : index
    %28 = vector.load %arg6[%c0_16, %c0_17] : memref<1x128xf32, #tpu.memory_space<vmem>>, vector<1x128xf32>
    %29 = arith.mulf %27, %28 : vector<1x128xf32>
    %c0_18 = arith.constant 0 : index
    %c0_19 = arith.constant 0 : index
    %30 = vector.load %arg7[%c0_18, %c0_19] : memref<1x128xf32, #tpu.memory_space<vmem>>, vector<1x128xf32>
    %31 = arith.mulf %17, %29 : vector<1x128xf32>
    %32 = arith.subf %30, %31 : vector<1x128xf32>
    %33 = vector.broadcast %29 : vector<1x128xf32> to vector<8x128xf32>
    %34 = arith.mulf %13, %33 : vector<8x128xf32>
    %35 = vector.broadcast %32 : vector<1x128xf32> to vector<8x128xf32>
    %36 = arith.addf %34, %35 : vector<8x128xf32>
    %cst_20 = arith.constant 0.000000e+00 : f32
    %37 = vector.broadcast %cst_20 : f32 to vector<8x128xf32>
    %38 = arith.maximumf %36, %37 : vector<8x128xf32>
    %39 = arith.truncf %38 : vector<8x128xf32> to vector<8x128xbf16>
    %c0_21 = arith.constant 0 : index
    %c0_22 = arith.constant 0 : index
    %40 = vector.load %arg8[%c0_21, %c0_22] : memref<128x128xbf16, #tpu.memory_space<vmem>>, vector<128x128xbf16>
    %cst_23 = arith.constant dense<0.000000e+00> : vector<8x128xf32>
    %41 = tpu.matmul %39, %40, %cst_23 {dimension_numbers = #tpu.dot_dimension_numbers<[1], [0], [0], [1], [0, 0, 1, 1], [], []>} : vector<8x128xbf16>, vector<128x128xbf16>, vector<8x128xf32> -> vector<8x128xf32>
    %c0_24 = arith.constant 0 : index
    %c0_25 = arith.constant 0 : index
    %42 = vector.load %arg9[%c0_24, %c0_25] : memref<1x128xf32, #tpu.memory_space<vmem>>, vector<1x128xf32>
    %43 = vector.broadcast %42 : vector<1x128xf32> to vector<8x128xf32>
    %44 = arith.addf %41, %43 : vector<8x128xf32>
    %c0_26 = arith.constant 0 : index
    %c0_27 = arith.constant 0 : index
    %45 = vector.load %arg10[%c0_26, %c0_27] : memref<8x128xf32, #tpu.memory_space<vmem>>, vector<8x128xf32>
    tpu.vector_store %arg10[%c0_26, %c0_27], %44 {strides = array<i32>} : memref<8x128xf32, #tpu.memory_space<vmem>>, vector<8x128xf32>,
    return
  }
  func.func @transform_0(%arg0: i32) -> (i32, i32) {
    %c0_i32 = arith.constant 0 : i32
    %c0_i32_0 = arith.constant 0 : i32
    %c0_i32_1 = arith.constant 0 : i32
    return %c0_i32, %c0_i32_0 : i32, i32
  }
  func.func @transform_1(%arg0: i32) -> (i32, i32) {
    %c0_i32 = arith.constant 0 : i32
    %c0_i32_0 = arith.constant 0 : i32
    %c0_i32_1 = arith.constant 0 : i32
    return %c0_i32, %c0_i32_0 : i32, i32
  }
  func.func @transform_2(%arg0: i32) -> (i32, i32) {
    %c0_i32 = arith.constant 0 : i32
    %c0_i32_0 = arith.constant 0 : i32
    %c0_i32_1 = arith.constant 0 : i32
    return %c0_i32, %c0_i32_0 : i32, i32
  }
  func.func @transform_3(%arg0: i32) -> (i32, i32) {
    %c0_i32 = arith.constant 0 : i32
    %c0_i32_0 = arith.constant 0 : i32
    %c0_i32_1 = arith.constant 0 : i32
    return %c0_i32, %c0_i32_0 : i32, i32
  }
  func.func @transform_4(%arg0: i32) -> (i32, i32) {
    %c0_i32 = arith.constant 0 : i32
    %c0_i32_0 = arith.constant 0 : i32
    %c0_i32_1 = arith.constant 0 : i32
    return %c0_i32, %c0_i32_0 : i32, i32
  }
  func.func @transform_5(%arg0: i32) -> (i32, i32) {
    %c0_i32 = arith.constant 0 : i32
    %c0_i32_0 = arith.constant 0 : i32
    %c0_i32_1 = arith.constant 0 : i32
    return %c0_i32, %c0_i32_0 : i32, i32
  }
  func.func @transform_6(%arg0: i32) -> (i32, i32) {
    %c0_i32 = arith.constant 0 : i32
    %c0_i32_0 = arith.constant 0 : i32
    %c0_i32_1 = arith.constant 0 : i32
    return %c0_i32, %c0_i32_0 : i32, i32
  }
  func.func @transform_7(%arg0: i32) -> (i32, i32) {
    %c0_i32 = arith.constant 0 : i32
    %c0_i32_0 = arith.constant 0 : i32
    %c0_i32_1 = arith.constant 0 : i32
    return %c0_i32, %c0_i32_0 : i32, i32
  }
  func.func @transform_8(%arg0: i32) -> (i32, i32) {
    %c0_i32 = arith.constant 0 : i32
    %c0_i32_0 = arith.constant 0 : i32
    %c0_i32_1 = arith.constant 0 : i32
    return %c0_i32, %c0_i32_0 : i32, i32
  }
  func.func @transform_9(%arg0: i32) -> (i32, i32) {
    %c0_i32 = arith.constant 0 : i32
    %c0_i32_0 = arith.constant 0 : i32
    %c0_i32_1 = arith.constant 0 : i32
    return %c0_i32, %c0_i32_0 : i32, i32
  }
}

</mosaic_0001>

<bundles_post_ra>
// kernel: mlp_bn_forward.1
= control target key start
LH: loop header
LB: loop body
LE: loop exit
PB: predicated region body
PF: predicated region fallthrough
CT: control target
= control target key end

     0   :  { %s632_s0 = inlined_call_operand.vmem [shape: bf16[8,128], index: 0, kind: input, shape index: {}]   ;;  %s633_s1 = inlined_call_operand.vmem [shape: bf16[128,128], index: 1, kind: input, shape index: {}]   ;;  %s634_s2 = inlined_call_operand.vmem [shape: f32[1,128], index: 2, kind: input, shape index: {}]   ;;  %s635_s3 = inlined_call_operand.vmem [shape: bf16[128,128], index: 3, kind: input, shape index: {}]   ;;  %s636_s4 = inlined_call_operand.vmem [shape: f32[1,128], index: 4, kind: input, shape index: {}]   ;;  %s637_s5 = inlined_call_operand.vmem [shape: f32[1,128], index: 5, kind: input, shape index: {}]   ;;  %s638_s6 = inlined_call_operand.vmem [shape: f32[1,128], index: 6, kind: input, shape index: {}]   ;;  %s639_s7 = inlined_call_operand.vmem [shape: bf16[128,128], index: 7, kind: input, shape index: {}]   ;;  %s640_s8 = inlined_call_operand.vmem [shape: f32[1,128], index: 8, kind: input, shape index: {}]   ;;  %s641_s9 = inlined_call_operand.hbm [shape: f32[8,128], index: 9, kind: output, shape index: {}]  }
   0x1   :  { %v439_v0 = vld [vmem:[%s633_s1 + $0x38] sm:$0xff]  ;;  %v438_v1 = vld [vmem:[%s633_s1 + $0x30] sm:$0xff]  ;;  %v437_v4 = vld [vmem:[%s633_s1 + $0x28] sm:$0xff] }
   0x2   :  { %102 = vmatpush.bf16.msra.mxu0 %v439_v0  ;;  %v447_v2 = vld [vmem:[%s635_s3 + $0x38] sm:$0xff]  ;;  %v446_v3 = vld [vmem:[%s635_s3 + $0x30] sm:$0xff] }
   0x3   :  { %185 = vmatpush.bf16.msra.mxu1 %v447_v2 }
   0x6   :  { %103 = vmatpush.bf16.msra.mxu0 %v438_v1 }
   0x7   :  { %14 = vsyncpa [#allocation3], 0  ;;  %186 = vmatpush.bf16.msra.mxu1 %v446_v3  ;;  %v445_v5 = vld [vmem:[%s635_s3 + $0x28] sm:$0xff]  ;;  %v436_v6 = vld [vmem:[%s633_s1 + $0x20] sm:$0xff] }
   0x8   :  { %v444_v7 = vld [vmem:[%s635_s3 + $0x20] sm:$0xff]  ;;  %v435_v8 = vld [vmem:[%s633_s1 + $0x18] sm:$0xff]  ;;  %v434_v10 = vld [vmem:[%s633_s1 + $0x10] sm:$0xff] }
   0x9   :  { %v443_v9 = vld [vmem:[%s635_s3 + $0x18] sm:$0xff]  ;;  %v442_v11 = vld [vmem:[%s635_s3 + $0x10] sm:$0xff]  ;;  %v433_v12 = vld [vmem:[%s633_s1 + $0x8] sm:$0xff] }
   0xa   :  { %104 = vmatpush.bf16.msra.mxu0 %v437_v4  ;;  %v432_v13 = vld [vmem:[%s633_s1] sm:$0xff]  ;;  %v441_v15 = vld [vmem:[%s635_s3 + $0x8] sm:$0xff]  ;;  %v455_v27 = vld [vmem:[%s639_s7 + $0x38] sm:$0xff] }
   0xb   :  { %187 = vmatpush.bf16.msra.mxu1 %v445_v5  ;;  %v33_v14 = vld [vmem:[%s632_s0] sm:$0xf]  ;;  %306 = vmatpush.bf16.msra.mxu2 %v455_v27  ;;  %v454_v29 = vld [vmem:[%s639_s7 + $0x30] sm:$0xff]  ;;  %v453_v33 = vld [vmem:[%s639_s7 + $0x28] sm:$0xff]  ;;  %s327_s0 = sshll.u32 %s641_s9, 4  ;;  %s328_s0 = int_to_ptr.hbm [resolvable:$true] %s327_s0 }
   0xc   :  { %v440_v16 = vld [vmem:[%s635_s3] sm:$0xff]  ;;  %v451_v39 = vld [vmem:[%s639_s7 + $0x18] sm:$0xff]  ;;  %v450_v42 = vld [vmem:[%s639_s7 + $0x10] sm:$0xff] }
   0xd   :  { %v457_v17 = vld [vmem:[%s634_s2] ss:$0 sm:$0xff]  ;;  %v449_v45 = vld [vmem:[%s639_s7 + $0x8] sm:$0xff] }
   0xe   :  { %105 = vmatpush.bf16.msra.mxu0 %v436_v6  ;;  %v458_v23 = vld [vmem:[%s636_s4] ss:$0 sm:$0xff] }
   0xf   :  { %188 = vmatpush.bf16.msra.mxu1 %v444_v7  ;;  %307 = vmatpush.bf16.msra.mxu2 %v454_v29  ;;  %v452_v36 = vld [vmem:[%s639_s7 + $0x20] sm:$0xff] }
  0x10   :  { %v448_v48 = vld [vmem:[%s639_s7] sm:$0xff] }
  0x11   :  { %v225_v58 = vld [vmem:[%s637_s5] sm:$0x1]  ;;  %s488_s5 = smov [#allocation2]  }
  0x12   :  { %106 = vmatpush.bf16.msra.mxu0 %v435_v8  ;;  %v227_v61 = vld [vmem:[%s638_s6] sm:$0x1]  ;;  %s325_s21 = sshll.u32 %s488_s5, 4  ;;  %s326_s21 = int_to_ptr.vmem [resolvable:$true] %s325_s21 }
  0x13   :  { %189 = vmatpush.bf16.msra.mxu1 %v443_v9  ;;  %308 = vmatpush.bf16.msra.mxu2 %v453_v33  ;;  %v459_v6 = vld [vmem:[%s640_s8] ss:$0 sm:$0xff] }
  0x16   :  { %107 = vmatpush.bf16.msra.mxu0 %v434_v10 }
  0x17   :  { %190 = vmatpush.bf16.msra.mxu1 %v442_v11  ;;  %309 = vmatpush.bf16.msra.mxu2 %v452_v36 }
  0x1a   :  { %108 = vmatpush.bf16.msra.mxu0 %v433_v12 }
  0x1b   :  { %191 = vmatpush.bf16.msra.mxu1 %v441_v15  ;;  %310 = vmatpush.bf16.msra.mxu2 %v451_v39 }
  0x1e   :  { %109 = vmatpush.bf16.msra.mxu0 %v432_v13 }
  0x1f   :  { %192 = vmatpush.bf16.msra.mxu1 %v440_v16  ;;  %311 = vmatpush.bf16.msra.mxu2 %v450_v42 }
  0x21   :  { %110 = vmatmul.bf16.vlgmr.msra.gmra.mxu0 %v33_v14 }
  0x23   :  { %312 = vmatpush.bf16.msra.mxu2 %v449_v45 }
  0x27   :  { %313 = vmatpush.bf16.msra.mxu2 %v448_v48 }
  0x9e   :  { %v111_v18 = vpop.f32.mrf.mxu0 }
  0x9f   :  { %v112_v19 = vadd.f32 %v457_v17, %v111_v18 }
  0xa1   :  { %v115_v20 = vmax.f32 %v112_v19, 0.0 }
  0xa3   :  { %v116_v21 = vpack.c.bf16 %v115_v20, %v115_v20 }
  0xa5   :  { %193 = vmatmul.bf16.vlgmr.msra.gmra.mxu1 %v116_v21 }
  0xa6   :  { %v113_v22 = vpop.f32.mrf.mxu0 }
 0x122   :  { %v194_v24 = vpop.f32.mrf.mxu1 }
 0x123   :  { %v195_v25 = vadd.f32 %v458_v23, %v194_v24 }
 0x125   :  { %v198_v26 = vrot.slane %v195_v25, 4 }
 0x127   :  { %v199_v28 = vadd.f32 %v198_v26, %v195_v25 }
 0x129   :  { %v200_v30 = vrot.slane %v199_v28, 2 }
 0x12a   :  { %v196_v31 = vpop.f32.mrf.mxu1 }
 0x12b   :  { %v201_v32 = vadd.f32 %v200_v30, %v199_v28 }
 0x12d   :  { %v202_v34 = vrot.slane %v201_v32, 1 }
 0x12f   :  { %v203_v35 = vadd.f32 %v202_v34, %v201_v32 }
 0x131   :  { %v204_v37 = vmul.f32 0.125, %v203_v35 }
 0x133   :  { %v205_v38 = vsub.f32 %v195_v25, %v204_v37 }
 0x135   :  { %v206_v40 = vmul.f32 %v205_v38, %v205_v38 }
 0x137   :  { %v207_v41 = vrot.slane %v206_v40, 4 }
 0x139   :  { %v208_v43 = vadd.f32 %v207_v41, %v206_v40 }
 0x13b   :  { %v209_v44 = vrot.slane %v208_v43, 2 }
 0x13d   :  { %v210_v46 = vadd.f32 %v209_v44, %v208_v43 }
 0x13f   :  { %v211_v47 = vrot.slane %v210_v46, 1 }
 0x141   :  { %v212_v49 = vadd.f32 %v211_v47, %v210_v46 }
 0x143   :  { %v213_v50 = vmul.f32 0.125, %v212_v49 }
 0x145   :  { %v214_v51 = vadd.f32 1e-05, %v213_v50 }
 0x147   :  { %460 = vrsqrt.f32 %v214_v51  ;;  %vm221_vm1 = vweird.f32 %v214_v51 }
 0x14d   :  { %v461_v52 = vpop.eup %460 }
 0x14e   :  { %v216_v53 = vmul.f32 %v461_v52, %v214_v51  ;;  %vm222_vm0 = vweird.f32 %v461_v52 }
 0x14f   :  { %vm223_vm2 = vmor %vm221_vm1, %vm222_vm0 }
 0x150   :  { %v217_v54 = vmul.f32 %v461_v52, %v216_v53 }
 0x152   :  { %v218_v55 = vmul.f32 0.5, %v217_v54 }
 0x154   :  { %v219_v56 = vsub.f32 1.5, %v218_v55 }
 0x156   :  { %v220_v57 = vmul.f32 %v461_v52, %v219_v56 }
 0x158   :  { %v224_v59 = vsel %vm223_vm2, %v461_v52, %v220_v57 }
 0x159   :  { %v226_v60 = vmul.f32 %v225_v58, %v224_v59 }
 0x15b   :  { %v228_v62 = vmul.f32 %v226_v60, %v204_v37  ;;  %v230_v63 = vperm.slane %v226_v60, 0 }
 0x15d   :  { %v229_v0 = vsub.f32 %v227_v61, %v228_v62  ;;  %v231_v1 = vmul.f32 %v230_v63, %v195_v25 }
 0x15f   :  { %v233_v2 = vperm.slane %v229_v0, 0 }
 0x161   :  { %v235_v3 = vadd.f32 %v233_v2, %v231_v1 }
 0x163   :  { %v236_v4 = vmax.f32 %v235_v3, 0.0 }
 0x165   :  { %v237_v5 = vpack.c.bf16 %v236_v4, %v236_v4 }
 0x167   :  { %314 = vmatmul.bf16.vlgmr.msra.gmra.mxu2 %v237_v5 }
 0x1ea   :  { %v315_v7 = vpop.f32.mrf.mxu2 }
 0x1eb   :  { %v316_v8 = vadd.f32 %v459_v6, %v315_v7 }
 0x1ed   :  { %319 = vst [vmem:[#allocation2] sm:$0xff] %v316_v8 }
 0x1ee   :  { %330 = dma.vmem_to_hbm [thread:$0]  %s326_s21, 128, %s328_s0, [#allocation3]  }
 0x1f2   :  { %v317_v9 = vpop.f32.mrf.mxu2 }
 0x1f3   :  { %486 = dma.done.wait [#allocation3], 128  }
 0x1f4   :  { %487 = vsyncadd [#allocation3], 4294967168 }
 0x1f5   :  { %335 = vsyncpa [#allocation3], 1 }

</bundles_post_ra>
